<compile_context>
chip_gen: v7x
topology: tpu7x:2x2x1
jax: 0.10.0
libtpu: 0.0.40
codegen_flags: <defaults>
</compile_context>

<pallas_src>
import functools

import jax
import jax.numpy as jnp
import numpy as np
from jax.experimental import pallas as pl
from jax.experimental.pallas import tpu as pltpu


# ----------------------------- kernel ---------------------------------------


def _flash_sdpa_kernel(q_ref, k_ref, v_ref, o_ref, m_ref, l_ref, acc_ref, *,
                       scale):
    """One (q-tile, k-tile) step of batched flash attention.

    q_ref: (B, tq, Dk)   k_ref: (B, tk, Dk)   v_ref: (B, tk, Dv)
    o_ref: (B, tq, Dv)
    m_ref/l_ref: (B, tq, 1) f32   acc_ref: (B, tq, Dv) f32
    """
    kv = pl.program_id(1)

    @pl.when(kv == 0)
    def _():
        m_ref[...] = jnp.full(m_ref.shape, -jnp.inf, dtype=m_ref.dtype)
        l_ref[...] = jnp.zeros(l_ref.shape, dtype=l_ref.dtype)
        acc_ref[...] = jnp.zeros(acc_ref.shape, dtype=acc_ref.dtype)

    q = q_ref[...]
    if scale is not None:
        # Fold the scale into Q: Lq*Dk multiplies instead of Lq*Lk.
        q = q * scale

    # Scores in f32 (softmax math stays f32 on all chip generations).
    s = jnp.einsum("bqd,bkd->bqk", q, k_ref[...],
                   preferred_element_type=jnp.float32)       # (B, tq, tk)

    m_prev = m_ref[...]
    m_new = jnp.maximum(m_prev, jnp.max(s, axis=-1, keepdims=True))
    alpha = jnp.exp(m_prev - m_new)
    p = jnp.exp(s - m_new)

    l_ref[...] = alpha * l_ref[...] + jnp.sum(p, axis=-1, keepdims=True)
    # Cast P to V's dtype so bf16 inputs use the MXU's native bf16 path;
    # accumulate in f32.
    acc_ref[...] = alpha * acc_ref[...] + jnp.einsum(
        "bqk,bkd->bqd", p.astype(v_ref.dtype), v_ref[...],
        preferred_element_type=jnp.float32)
    m_ref[...] = m_new

    @pl.when(kv == pl.num_programs(1) - 1)
    def _():
        # Exact divide (not approx reciprocal) for torch.softmax parity.
        o_ref[...] = (acc_ref[...] / l_ref[...]).astype(o_ref.dtype)


# ----------------------------- wrapper ---------------------------------------


def _pick_tile(n, target):
    """Largest tile <= target that tiles n and satisfies the sublane rule
    (multiple of 8, or the full extent)."""
    if n <= target:
        return n
    t = (target // 8) * 8
    while t >= 8:
        if n % t == 0:
            return t
        t -= 8
    return n  # fall back to the full extent (still correct)


def scaled_dot_product_attention(Q, K, V, scale=None):
    """Pallas equivalent of Scaled_Dot_Product_Attention.forward (returns context)."""
    B, Lq, Dk = Q.shape
    _, Lk, _ = K.shape
    _, _, Dv = V.shape

    # Mirror PyTorch's `if scale:` truthiness (None / 0.0 -> no scaling).
    scale_const = float(scale) if scale else None

    tq = _pick_tile(Lq, 256)
    tk = _pick_tile(Lk, 512)
    grid = (Lq // tq, Lk // tk)

    flops = 2 * B * Lq * Lk * (Dk + Dv)
    bytes_accessed = int(Q.size * Q.dtype.itemsize + K.size * K.dtype.itemsize +
                         V.size * V.dtype.itemsize + B * Lq * Dv * Q.dtype.itemsize)

    return pl.pallas_call(
        functools.partial(_flash_sdpa_kernel, scale=scale_const),
        out_shape=jax.ShapeDtypeStruct((B, Lq, Dv), Q.dtype),
        grid=grid,
        in_specs=[
            pl.BlockSpec((B, tq, Dk), lambda qi, ki: (0, qi, 0)),
            pl.BlockSpec((B, tk, Dk), lambda qi, ki: (0, ki, 0)),
            pl.BlockSpec((B, tk, Dv), lambda qi, ki: (0, ki, 0)),
        ],
        out_specs=pl.BlockSpec((B, tq, Dv), lambda qi, ki: (0, qi, 0)),
        scratch_shapes=[
            pltpu.VMEM((B, tq, 1), jnp.float32),   # running max m
            pltpu.VMEM((B, tq, 1), jnp.float32),   # running denom l
            pltpu.VMEM((B, tq, Dv), jnp.float32),  # running numerator acc
        ],
        compiler_params=pltpu.CompilerParams(
            dimension_semantics=("parallel", "arbitrary")),
        cost_estimate=pl.CostEstimate(
            flops=flops,
            transcendentals=B * Lq * Lk,
            bytes_accessed=bytes_accessed),
    )(Q, K, V)


# ----------------------------- pure-JAX reference ----------------------------


def sdpa_reference(Q, K, V, scale=None):
    attn = jnp.einsum("bqd,bkd->bqk", Q, K)
    if scale:
        attn = attn * scale
    attn = jax.nn.softmax(attn, axis=-1)
    return jnp.einsum("bqk,bkd->bqd", attn, V)


# ----------------------------- main -------------------------------------------


if __name__ == "__main__":
    # Shapes consistent with the Transformer usage: [batch, seq_len, dim].
    B, L, D = 2, 8, 32

    key = jax.random.PRNGKey(0)
    kq, kk, kv = jax.random.split(key, 3)
    Q = jax.random.normal(kq, (B, L, D), jnp.float32)
    K = jax.random.normal(kk, (B, L, D), jnp.float32)
    V = jax.random.normal(kv, (B, L, D), jnp.float32)

    # With scale (the usual 1/sqrt(d_k) case in the Transformer).
    scale = 1.0 / float(np.sqrt(D))
    ctx = jax.block_until_ready(scaled_dot_product_attention(Q, K, V, scale=scale))
    ctx_ref = jax.block_until_ready(sdpa_reference(Q, K, V, scale=scale))
    np.testing.assert_allclose(np.asarray(ctx), np.asarray(ctx_ref),
                               rtol=1e-3, atol=1e-3)

    # Without scale (the module's scale=None default path).
    ctx_ns = jax.block_until_ready(scaled_dot_product_attention(Q, K, V))
    ctx_ns_ref = jax.block_until_ready(sdpa_reference(Q, K, V))
    np.testing.assert_allclose(np.asarray(ctx_ns), np.asarray(ctx_ns_ref),
                               rtol=1e-3, atol=1e-3)

    # Medium length to exercise the multi-tile online-softmax path (2 k-tiles).
    Lm = 1024
    Qm = jax.random.normal(kq, (B, Lm, D), jnp.float32)
    Km = jax.random.normal(kk, (B, Lm, D), jnp.float32)
    Vm = jax.random.normal(kv, (B, Lm, D), jnp.float32)
    ctx_m = jax.block_until_ready(
        scaled_dot_product_attention(Qm, Km, Vm, scale=scale))
    ctx_m_ref = jax.block_until_ready(sdpa_reference(Qm, Km, Vm, scale=scale))
    np.testing.assert_allclose(np.asarray(ctx_m), np.asarray(ctx_m_ref),
                               rtol=1e-3, atol=1e-3)

    print("KERNEL_OK")
</pallas_src>

<mosaic_0001>
module attributes {stable_mosaic.version = 11 : i64} {
  func.func @_flash_sdpa_kernel(%arg0: i32, %arg1: i32, %arg2: memref<2x8x32xf32, #tpu.memory_space<vmem>>, %arg3: memref<2x8x32xf32, #tpu.memory_space<vmem>>, %arg4: memref<2x8x32xf32, #tpu.memory_space<vmem>>, %arg5: memref<2x8x32xf32, #tpu.memory_space<vmem>>, %arg6: memref<2x8x1xf32, #tpu.memory_space<vmem>>, %arg7: memref<2x8x1xf32, #tpu.memory_space<vmem>>, %arg8: memref<2x8x32xf32, #tpu.memory_space<vmem>>) attributes {dimension_semantics = [#tpu.dimension_semantics<parallel>, #tpu.dimension_semantics<arbitrary>], iteration_bounds = array<i64: 1, 1>, scalar_prefetch = 0 : i64, scratch_operands = 3 : i64, tpu.core_type = #tpu.core_type<tc>, window_params = [{transform_indices = @transform_0, window_bounds = array<i64: 2, 8, 32>}, {transform_indices = @transform_1, window_bounds = array<i64: 2, 8, 32>}, {transform_indices = @transform_2, window_bounds = array<i64: 2, 8, 32>}, {transform_indices = @transform_3, window_bounds = array<i64: 2, 8, 32>}]} {
    %c0_i32 = arith.constant 0 : i32
    %0 = arith.cmpi eq, %arg1, %c0_i32 : i32
    %1 = arith.extui %0 : i1 to i32
    %c0_i32_0 = arith.constant 0 : i32
    %2 = arith.cmpi ne, %1, %c0_i32_0 : i32
    scf.if %2 {
      %cst_33 = arith.constant 0xFF800000 : f32
      %34 = vector.broadcast %cst_33 : f32 to vector<2x8x1xf32>
      %c0_34 = arith.constant 0 : index
      %c0_35 = arith.constant 0 : index
      %c0_36 = arith.constant 0 : index
      %35 = vector.load %arg6[%c0_34, %c0_35, %c0_36] : memref<2x8x1xf32, #tpu.memory_space<vmem>>, vector<2x8x1xf32>
      tpu.vector_store %arg6[%c0_34, %c0_35, %c0_36], %34 {strides = array<i32>} : memref<2x8x1xf32, #tpu.memory_space<vmem>>, vector<2x8x1xf32>,
      %cst_37 = arith.constant 0.000000e+00 : f32
      %36 = vector.broadcast %cst_37 : f32 to vector<2x8x1xf32>
      %c0_38 = arith.constant 0 : index
      %c0_39 = arith.constant 0 : index
      %c0_40 = arith.constant 0 : index
      %37 = vector.load %arg7[%c0_38, %c0_39, %c0_40] : memref<2x8x1xf32, #tpu.memory_space<vmem>>, vector<2x8x1xf32>
      tpu.vector_store %arg7[%c0_38, %c0_39, %c0_40], %36 {strides = array<i32>} : memref<2x8x1xf32, #tpu.memory_space<vmem>>, vector<2x8x1xf32>,
      %cst_41 = arith.constant 0.000000e+00 : f32
      %38 = vector.broadcast %cst_41 : f32 to vector<2x8x32xf32>
      %c0_42 = arith.constant 0 : index
      %c0_43 = arith.constant 0 : index
      %c0_44 = arith.constant 0 : index
      %39 = vector.load %arg8[%c0_42, %c0_43, %c0_44] : memref<2x8x32xf32, #tpu.memory_space<vmem>>, vector<2x8x32xf32>
      tpu.vector_store %arg8[%c0_42, %c0_43, %c0_44], %38 {strides = array<i32>} : memref<2x8x32xf32, #tpu.memory_space<vmem>>, vector<2x8x32xf32>,
    } else {
    }
    %c0 = arith.constant 0 : index
    %c0_1 = arith.constant 0 : index
    %c0_2 = arith.constant 0 : index
    %3 = vector.load %arg2[%c0, %c0_1, %c0_2] : memref<2x8x32xf32, #tpu.memory_space<vmem>>, vector<2x8x32xf32>
    %cst = arith.constant 0.176776692 : f32
    %4 = vector.broadcast %cst : f32 to vector<2x8x32xf32>
    %5 = arith.mulf %3, %4 : vector<2x8x32xf32>
    %c0_3 = arith.constant 0 : index
    %c0_4 = arith.constant 0 : index
    %c0_5 = arith.constant 0 : index
    %6 = vector.load %arg3[%c0_3, %c0_4, %c0_5] : memref<2x8x32xf32, #tpu.memory_space<vmem>>, vector<2x8x32xf32>
    "tpu.trace_start"() <{level = 10 : i32, message = "bqd,bkd->bqk"}> : () -> ()
    %cst_6 = arith.constant dense<0.000000e+00> : vector<2x8x8xf32>
    %7 = tpu.matmul %5, %6, %cst_6 {dimension_numbers = #tpu.dot_dimension_numbers<[2], [2], [1], [1], [0, 0, 0, 1, 1, 1], [0], [0]>} : vector<2x8x32xf32>, vector<2x8x32xf32>, vector<2x8x8xf32> -> vector<2x8x8xf32>
    "tpu.trace_stop"() : () -> ()
    %c0_7 = arith.constant 0 : index
    %c0_8 = arith.constant 0 : index
    %c0_9 = arith.constant 0 : index
    %8 = vector.load %arg6[%c0_7, %c0_8, %c0_9] : memref<2x8x1xf32, #tpu.memory_space<vmem>>, vector<2x8x1xf32>
    %cst_10 = arith.constant dense<0xFF800000> : vector<2x8xf32>
    %9 = vector.multi_reduction <maximumf>, %7, %cst_10 [2] : vector<2x8x8xf32> to vector<2x8xf32>
    %10 = vector.shape_cast %9 : vector<2x8xf32> to vector<2x8x1xf32>
    %11 = arith.maximumf %8, %10 : vector<2x8x1xf32>
    %12 = arith.subf %8, %11 : vector<2x8x1xf32>
    %13 = math.exp %12 : vector<2x8x1xf32>
    %14 = vector.broadcast %11 : vector<2x8x1xf32> to vector<2x8x8xf32>
    %15 = arith.subf %7, %14 : vector<2x8x8xf32>
    %16 = math.exp %15 : vector<2x8x8xf32>
    %c0_11 = arith.constant 0 : index
    %c0_12 = arith.constant 0 : index
    %c0_13 = arith.constant 0 : index
    %17 = vector.load %arg7[%c0_11, %c0_12, %c0_13] : memref<2x8x1xf32, #tpu.memory_space<vmem>>, vector<2x8x1xf32>
    %18 = arith.mulf %13, %17 : vector<2x8x1xf32>
    %cst_14 = arith.constant dense<0.000000e+00> : vector<2x8xf32>
    %19 = vector.multi_reduction <add>, %16, %cst_14 [2] : vector<2x8x8xf32> to vector<2x8xf32>
    %20 = vector.shape_cast %19 : vector<2x8xf32> to vector<2x8x1xf32>
    %21 = arith.addf %18, %20 : vector<2x8x1xf32>
    %c0_15 = arith.constant 0 : index
    %c0_16 = arith.constant 0 : index
    %c0_17 = arith.constant 0 : index
    %22 = vector.load %arg7[%c0_15, %c0_16, %c0_17] : memref<2x8x1xf32, #tpu.memory_space<vmem>>, vector<2x8x1xf32>
    tpu.vector_store %arg7[%c0_15, %c0_16, %c0_17], %21 {strides = array<i32>} : memref<2x8x1xf32, #tpu.memory_space<vmem>>, vector<2x8x1xf32>,
    %c0_18 = arith.constant 0 : index
    %c0_19 = arith.constant 0 : index
    %c0_20 = arith.constant 0 : index
    %23 = vector.load %arg8[%c0_18, %c0_19, %c0_20] : memref<2x8x32xf32, #tpu.memory_space<vmem>>, vector<2x8x32xf32>
    %24 = vector.broadcast %13 : vector<2x8x1xf32> to vector<2x8x32xf32>
    %25 = arith.mulf %24, %23 : vector<2x8x32xf32>
    %c0_21 = arith.constant 0 : index
    %c0_22 = arith.constant 0 : index
    %c0_23 = arith.constant 0 : index
    %26 = vector.load %arg4[%c0_21, %c0_22, %c0_23] : memref<2x8x32xf32, #tpu.memory_space<vmem>>, vector<2x8x32xf32>
    "tpu.trace_start"() <{level = 10 : i32, message = "bqk,bkd->bqd"}> : () -> ()
    %cst_24 = arith.constant dense<0.000000e+00> : vector<2x8x32xf32>
    %27 = tpu.matmul %16, %26, %cst_24 {dimension_numbers = #tpu.dot_dimension_numbers<[2], [1], [1], [2], [0, 0, 0, 1, 1, 2], [0], [0]>} : vector<2x8x8xf32>, vector<2x8x32xf32>, vector<2x8x32xf32> -> vector<2x8x32xf32>
    "tpu.trace_stop"() : () -> ()
    %28 = arith.addf %25, %27 : vector<2x8x32xf32>
    %c0_25 = arith.constant 0 : index
    %c0_26 = arith.constant 0 : index
    %c0_27 = arith.constant 0 : index
    %29 = vector.load %arg8[%c0_25, %c0_26, %c0_27] : memref<2x8x32xf32, #tpu.memory_space<vmem>>, vector<2x8x32xf32>
    tpu.vector_store %arg8[%c0_25, %c0_26, %c0_27], %28 {strides = array<i32>} : memref<2x8x32xf32, #tpu.memory_space<vmem>>, vector<2x8x32xf32>,
    %c0_28 = arith.constant 0 : index
    %c0_29 = arith.constant 0 : index
    %c0_30 = arith.constant 0 : index
    %30 = vector.load %arg6[%c0_28, %c0_29, %c0_30] : memref<2x8x1xf32, #tpu.memory_space<vmem>>, vector<2x8x1xf32>
    tpu.vector_store %arg6[%c0_28, %c0_29, %c0_30], %11 {strides = array<i32>} : memref<2x8x1xf32, #tpu.memory_space<vmem>>, vector<2x8x1xf32>,
    %c0_i32_31 = arith.constant 0 : i32
    %31 = arith.cmpi eq, %arg1, %c0_i32_31 : i32
    %32 = arith.extui %31 : i1 to i32
    %c0_i32_32 = arith.constant 0 : i32
    %33 = arith.cmpi ne, %32, %c0_i32_32 : i32
    scf.if %33 {
      %c0_33 = arith.constant 0 : index
      %c0_34 = arith.constant 0 : index
      %c0_35 = arith.constant 0 : index
      %34 = vector.load %arg8[%c0_33, %c0_34, %c0_35] : memref<2x8x32xf32, #tpu.memory_space<vmem>>, vector<2x8x32xf32>
      %c0_36 = arith.constant 0 : index
      %c0_37 = arith.constant 0 : index
      %c0_38 = arith.constant 0 : index
      %35 = vector.load %arg7[%c0_36, %c0_37, %c0_38] : memref<2x8x1xf32, #tpu.memory_space<vmem>>, vector<2x8x1xf32>
      %36 = vector.broadcast %35 : vector<2x8x1xf32> to vector<2x8x32xf32>
      %37 = arith.divf %34, %36 : vector<2x8x32xf32>
      %c0_39 = arith.constant 0 : index
      %c0_40 = arith.constant 0 : index
      %c0_41 = arith.constant 0 : index
      %38 = vector.load %arg5[%c0_39, %c0_40, %c0_41] : memref<2x8x32xf32, #tpu.memory_space<vmem>>, vector<2x8x32xf32>
      tpu.vector_store %arg5[%c0_39, %c0_40, %c0_41], %37 {strides = array<i32>} : memref<2x8x32xf32, #tpu.memory_space<vmem>>, vector<2x8x32xf32>,
    } else {
    }
    return
  }
  func.func @transform_0(%arg0: i32, %arg1: i32) -> (i32, i32, i32) {
    %c0_i32 = arith.constant 0 : i32
    %c0_i32_0 = arith.constant 0 : i32
    %c0_i32_1 = arith.constant 0 : i32
    return %c0_i32, %arg0, %c0_i32_0 : i32, i32, i32
  }
  func.func @transform_1(%arg0: i32, %arg1: i32) -> (i32, i32, i32) {
    %c0_i32 = arith.constant 0 : i32
    %c0_i32_0 = arith.constant 0 : i32
    %c0_i32_1 = arith.constant 0 : i32
    return %c0_i32, %arg1, %c0_i32_0 : i32, i32, i32
  }
  func.func @transform_2(%arg0: i32, %arg1: i32) -> (i32, i32, i32) {
    %c0_i32 = arith.constant 0 : i32
    %c0_i32_0 = arith.constant 0 : i32
    %c0_i32_1 = arith.constant 0 : i32
    return %c0_i32, %arg1, %c0_i32_0 : i32, i32, i32
  }
  func.func @transform_3(%arg0: i32, %arg1: i32) -> (i32, i32, i32) {
    %c0_i32 = arith.constant 0 : i32
    %c0_i32_0 = arith.constant 0 : i32
    %c0_i32_1 = arith.constant 0 : i32
    return %c0_i32, %arg0, %c0_i32_0 : i32, i32, i32
  }
}

</mosaic_0001>

<bundles_post_ra>
// kernel: tpu_custom_call.1
= control target key start
LH: loop header
LB: loop body
LE: loop exit
PB: predicated region body
PF: predicated region fallthrough
CT: control target
= control target key end

     0   :  { %8 = vsyncpa [#allocation6], 0  ;;  %s761_s0 = inlined_call_operand.hbm [shape: f32[2,8,32], index: 0, kind: input, shape index: {}]   ;;  %s762_s1 = inlined_call_operand.hbm [shape: f32[2,8,32], index: 1, kind: input, shape index: {}]   ;;  %s763_s2 = inlined_call_operand.hbm [shape: f32[2,8,32], index: 2, kind: input, shape index: {}]   ;;  %s764_s3 = inlined_call_operand.hbm [shape: f32[2,8,32], index: 3, kind: output, shape index: {}]  }
   0x1   :  { %9 = vsyncpa [#allocation9], 0 }
   0x2   :  { %10 = vsyncpa [#allocation7], 0  ;;  %s636_s12 = smov [#allocation8]   ;;  %s637_s14 = smov [#allocation5]  }
   0x3   :  { %s28_s13 = sshll.u32 %s636_s12, 4  ;;  %s16_s15 = sshll.u32 %s637_s14, 4  ;;  %s29_s13 = int_to_ptr.vmem [resolvable:$true] %s28_s13  ;;  %s666_s15 = int_to_ptr.vmem [resolvable:$true] %s16_s15 }
   0x4   :  { %s542_s18 = scalar_lea.hbm %s762_s1, 256 }
   0x5   :  { %p543_p0 = scmp.ne.s32.totalorder %s762_s1, %s542_s18  ;;  %p546_p1 = scmp.lt.u32.totalorder %s542_s18, %s762_s1 }
   0x7   :  { %p548_p2 = pnand %p546_p1, %p543_p0 }
   0x9   :  { %551 = shalt.err (!%p548_p2)
}
   0xa   :  { %s552_s23 = scalar_lea.vmem %s29_s13, 256  ;;  %p557_p4 = scmp.lt.s32.totalorder %s29_s13, %s29_s13 }
   0xb   :  { %p553_p3 = scmp.ne.s32.totalorder %s29_s13, %s552_s23  ;;  %p558_p5 = scmp.lt.s32.totalorder %s552_s23, %s552_s23 }
   0xd   :  { %p559_p6 = por %p558_p5, %p557_p4 }
   0xf   :  { %p560_p7 = pnand %p559_p6, %p553_p3 }
  0x11   :  { %563 = shalt.err (!%p560_p7)
}
  0x12   :  { %s638_s24 = smov 128   ;;  %s639_s25 = smov 8  }
  0x13   :  { %34 = dma.hbm_to_vmem [thread:$0]  %s762_s1, 256, %s29_s13, [#allocation9], %s638_s24, %s638_s24, %s639_s25  }
  0x14   :  { %s564_s30 = scalar_lea.hbm %s761_s0, 256 }
  0x15   :  { %p565_p8 = scmp.ne.s32.totalorder %s761_s0, %s564_s30  ;;  %p568_p9 = scmp.lt.u32.totalorder %s564_s30, %s761_s0 }
  0x17   :  { %p570_p10 = pnand %p568_p9, %p565_p8 }
  0x19   :  { %573 = shalt.err (!%p570_p10)
}
  0x1a   :  { %s574_s8 = scalar_lea.vmem %s666_s15, 256  ;;  %p579_p12 = scmp.lt.s32.totalorder %s666_s15, %s666_s15 }
  0x1b   :  { %p575_p11 = scmp.ne.s32.totalorder %s666_s15, %s574_s8  ;;  %p580_p13 = scmp.lt.s32.totalorder %s574_s8, %s574_s8 }
  0x1d   :  { %p581_p0 = por %p580_p13, %p579_p12 }
  0x1f   :  { %p582_p1 = pnand %p581_p0, %p575_p11 }
  0x21   :  { %585 = shalt.err (!%p582_p1)
}
  0x22   :  { %22 = dma.hbm_to_vmem [thread:$0]  %s761_s0, 256, %s666_s15, [#allocation6], %s638_s24, %s638_s24, %s639_s25  }
  0x23   :  { %s640_s10 = smov [#allocation10]   ;;  %s586_s14 = scalar_lea.hbm %s763_s2, 256 }
  0x24   :  { %s40_s11 = sshll.u32 %s640_s10, 4  ;;  %p587_p2 = scmp.ne.s32.totalorder %s763_s2, %s586_s14  ;;  %s41_s11 = int_to_ptr.vmem [resolvable:$true] %s40_s11 }
  0x25   :  { %p590_p3 = scmp.lt.u32.totalorder %s586_s14, %s763_s2 }
  0x27   :  { %p592_p4 = pnand %p590_p3, %p587_p2 }
  0x29   :  { %595 = shalt.err (!%p592_p4)
}
  0x2a   :  { %s596_s20 = scalar_lea.vmem %s41_s11, 256  ;;  %p601_p6 = scmp.lt.s32.totalorder %s41_s11, %s41_s11 }
  0x2b   :  { %p597_p5 = scmp.ne.s32.totalorder %s41_s11, %s596_s20  ;;  %p602_p7 = scmp.lt.s32.totalorder %s596_s20, %s596_s20 }
  0x2d   :  { %p603_p8 = por %p602_p7, %p601_p6 }
  0x2f   :  { %p604_p9 = pnand %p603_p8, %p597_p5 }
  0x31   :  { %607 = shalt.err (!%p604_p9)
}
  0x32   :  { %46 = dma.hbm_to_vmem [thread:$0]  %s763_s2, 256, %s41_s11, [#allocation9], %s638_s24, %s638_s24, %s639_s25  }
  0x33   :  { %630 = dma.done.wait [#allocation6], 256  }
  0x34   :  { %631 = vsyncadd [#allocation6], 4294967040 }
  0x35   :  { %632 = dma.done.wait [#allocation9], 512  }
  0x36   :  { %633 = vsyncadd [#allocation9], 4294966784  ;;  %vm65_vm0 = vcmask 261120   ;;  %v641_v0 = vmov 0.0   ;;  %vm642_vm1 = vmmov 0   ;;  %v72_v1 = vld [vmem:[#allocation8] sm:$0xff] }
  0x37   :  { %498 = vmatprep.subr.mxu0 %v641_v0  ;;  %66 = vst.msk [vmem:[#allocation4] sm:$0xff] %vm65_vm0, %v641_v0  ;;  %67 = vst.msk [vmem:[#allocation4 + $0x8] sm:$0xff] %vm65_vm0, %v641_v0  ;;  %500 = vmatprep.mubr.msk.f32.mxu0 %vm642_vm1, %v641_v0  ;;  %v68_v2 = vld [vmem:[#allocation5] sm:$0xff]  ;;  %v73_v3 = vld [vmem:[#allocation8 + $0x8] sm:$0xff]  ;;  %vm60_vm2 = vcmask 7168   ;;  %v643_v7 = vmov -inf  }
  0x38   :  { %503 = vmatprep.subr.mxu1 %v641_v0  ;;  %505 = vmatprep.mubr.msk.f32.mxu1 %vm642_vm1, %v641_v0  ;;  %v70_v4 = vmul.f32 0.17677669, %v68_v2  ;;  %v69_v5 = vld [vmem:[#allocation5 + $0x8] sm:$0xff]  ;;  %61 = vst.msk [vmem:[#allocation2] sm:$0xff] %vm60_vm2, %v643_v7  ;;  %62 = vst.msk [vmem:[#allocation2 + $0x8] sm:$0xff] %vm60_vm2, %v643_v7  ;;  %vm229_vm3 = vcmask 64512  }
  0x39   :  { %499 = vmatpush3.xpose.msk.msra.mxu0 %vm65_vm0, %v72_v1  ;;  %504 = vmatpush3.xpose.msk.msra.mxu1 %vm65_vm0, %v73_v3  ;;  %v71_v6 = vmul.f32 0.17677669, %v69_v5  ;;  %63 = vst.msk [vmem:[#allocation3] sm:$0xff] %vm60_vm2, %v641_v0  ;;  %64 = vst.msk [vmem:[#allocation3 + $0x8] sm:$0xff] %vm60_vm2, %v641_v0  ;;  %v644_v14 = vmov 0   ;;  %v289_v23 = vld [vmem:[#allocation10] sm:$0xff] }
  0x3a   :  { %508 = vmatprep.subr.mxu0 %v641_v0  ;;  %513 = vmatprep.subr.mxu1 %v641_v0  ;;  %v290_v24 = vld [vmem:[#allocation10 + $0x8] sm:$0xff]  ;;  %s645_s2 = smov [#allocation11]  }
  0x3b   :  { %528 = vset.pattern.permute.xlu1 %v644_v14  ;;  %529 = vset.pattern.permute.xlu0 %v644_v14  ;;  %s471_s21 = sshll.u32 %s645_s2, 4  ;;  %s472_s21 = int_to_ptr.vmem [resolvable:$true] %s471_s21 }
  0x3c   :  { %501 = vmatmul.mubr.msk.f32.vlgmr.msra.gmra.mrb[0].mxu0 %vm65_vm0, %v70_v4  ;;  %506 = vmatmul.mubr.msk.f32.vlgmr.msra.gmra.mrb[0].mxu1 %vm65_vm0, %v71_v6  ;;  %s608_s22 = scalar_lea.vmem %s472_s21, 256  ;;  %p613_p11 = scmp.lt.s32.totalorder %s472_s21, %s472_s21 }
  0x3d   :  { %510 = vmatprep.mubr.msk.f32.mxu0 %vm642_vm1, %v641_v0  ;;  %515 = vmatprep.mubr.msk.f32.mxu1 %vm642_vm1, %v641_v0  ;;  %p609_p10 = scmp.ne.s32.totalorder %s472_s21, %s608_s22  ;;  %p614_p12 = scmp.lt.s32.totalorder %s608_s22, %s608_s22 }
  0x3e   :  { %509 = vmatpush3.msra.mxu0 %v289_v23  ;;  %514 = vmatpush3.msra.mxu1 %v290_v24  ;;  %v275_v49 = vld [vmem:[#allocation4] sm:$0xff]  ;;  %v276_v52 = vld [vmem:[#allocation4 + $0x8] sm:$0xff] }
  0x3f   :  { %v227_v15 = vld [vmem:[#allocation2] sm:$0xff]  ;;  %v228_v18 = vld [vmem:[#allocation2 + $0x8] sm:$0xff]  ;;  %p615_p13 = por %p614_p12, %p613_p11 }
  0x40   :  { %v260_v39 = vld [vmem:[#allocation3] sm:$0xff]  ;;  %v261_v42 = vld [vmem:[#allocation3 + $0x8] sm:$0xff] }
  0x41   :  { %p616_p0 = pnand %p615_p13, %p609_p10 }
 0x10f   :  { %v147_v8 = vpop.f32.mrb[0].mxu0  ;;  %v223_v9 = vpop.f32.mrb[0].mxu1 }
 0x110   :  { %v502_v10 = vpop.f32.mrb[1].mxu0  ;;  %v230_v11 = vsel %vm229_vm3, %v147_v8, -inf  ;;  %v507_v12 = vpop.f32.mrb[1].mxu1  ;;  %v233_v13 = vsel %vm229_vm3, %v223_v9, -inf }
 0x111   :  { %231 = vmax.xlane.f32.xlu0 %v230_v11 }
 0x115   :  { %234 = vmax.xlane.f32.xlu0 %v233_v13 }
 0x19e   :  { %v232_v16 = vpop.xlane.xlu0 %231 }
 0x19f   :  { %v236_v17 = vmax.f32 %v227_v15, %v232_v16 }
 0x1a1   :  { %v238_v19 = vsub.f32 %v227_v15, %v236_v17  ;;  %441 = vst.msk [vmem:[#allocation2] sm:$0xff] %vm60_vm2, %v236_v17  ;;  %246 = vperm.xlu1 %528, %v236_v17  }
 0x1a2   :  { %v235_v20 = vpop.xlane.xlu0 %234 }
 0x1a3   :  { %v237_v21 = vmax.f32 %v228_v18, %v235_v20  ;;  %v240_v36 = vmul.f32 1.442695, %v238_v19 }
 0x1a5   :  { %v239_v22 = vsub.f32 %v228_v18, %v237_v21  ;;  %442 = vst.msk [vmem:[#allocation2 + $0x8] sm:$0xff] %vm60_vm2, %v237_v21  ;;  %251 = vperm.xlu1 %528, %v237_v21  }
 0x1a7   :  { %v242_v35 = vmul.f32 1.442695, %v239_v22 }
 0x220   :  { %v247_v25 = vpop.permute.xlu1 %246 }
 0x221   :  { %v254_v26 = vsub.f32 %v147_v8, %v247_v25 }
 0x223   :  { %v256_v27 = vmul.f32 1.442695, %v254_v26 }
 0x224   :  { %v252_v28 = vpop.permute.xlu1 %251 }
 0x225   :  { %530 = vpow2.f32 %v256_v27  ;;  %v255_v29 = vsub.f32 %v223_v9, %v252_v28 }
 0x227   :  { %v258_v30 = vmul.f32 1.442695, %v255_v29 }
 0x229   :  { %532 = vpow2.f32 %v258_v30 }
 0x22a   :  { %534 = vpow2.f32 %v242_v35 }
 0x22b   :  { %536 = vpow2.f32 %v240_v36 }
 0x22f   :  { %v531_v31 = vpop.eup %530 }
 0x230   :  { %511 = vmatmul.mubr.msk.f32.vlgmr.msra.gmra.mrb[2].mxu0 %vm229_vm3, %v531_v31  ;;  %v264_v32 = vsel %vm229_vm3, %v531_v31, 0.0 }
 0x231   :  { %265 = vadd.xlane.f32.xlu0 %v264_v32 }
 0x233   :  { %v533_v33 = vpop.eup %532 }
 0x234   :  { %516 = vmatmul.mubr.msk.f32.vlgmr.msra.gmra.mrb[2].mxu1 %vm229_vm3, %v533_v33  ;;  %v267_v34 = vsel %vm229_vm3, %v533_v33, 0.0  ;;  %v535_v37 = vpop.eup %534 }
 0x235   :  { %268 = vadd.xlane.f32.xlu1 %v267_v34  ;;  %v537_v38 = vpop.eup %536  ;;  %v263_v44 = vmul.f32 %v535_v37, %v261_v42 }
 0x236   :  { %v262_v40 = vmul.f32 %v537_v38, %v260_v39 }
 0x246   :  { %284 = vperm.xlu1 %528, %v535_v37  }
 0x247   :  { %279 = vperm.xlu0 %529, %v537_v38  }
 0x2be   :  { %v266_v41 = vpop.xlane.xlu0 %265 }
 0x2bf   :  { %v270_v43 = vadd.f32 %v266_v41, %v262_v40 }
 0x2c1   :  { %273 = vst.msk [vmem:[#allocation3] sm:$0xff] %vm60_vm2, %v270_v43 }
 0x2c2   :  { %v269_v45 = vpop.xlane.xlu1 %268 }
 0x2c3   :  { %v271_v46 = vadd.f32 %v269_v45, %v263_v44 }
 0x2c5   :  { %274 = vst.msk [vmem:[#allocation3 + $0x8] sm:$0xff] %vm60_vm2, %v271_v46 }
 0x2c6   :  { %v280_v50 = vpop.permute.xlu0 %279  ;;  %v285_v53 = vpop.permute.xlu1 %284 }
 0x2c7   :  { %v287_v51 = vmul.f32 %v280_v50, %v275_v49  ;;  %v288_v57 = vmul.f32 %v285_v53, %v276_v52 }
 0x2c8   :  { %v448_v47 = vld [vmem:[#allocation3] sm:$0xff] }
 0x2c9   :  { %452 = vperm.xlu0 %529, %v448_v47  }
 0x2cc   :  { %v449_v48 = vld [vmem:[#allocation3 + $0x8] sm:$0xff] }
 0x2cd   :  { %457 = vperm.xlu0 %529, %v449_v48  }
 0x303   :  { %v360_v54 = vpop.f32.mrb[2].mxu0 }
 0x304   :  { %v437_v55 = vadd.f32 %v360_v54, %v287_v51  ;;  %v512_v56 = vpop.f32.mrb[3].mxu0 }
 0x306   :  { %439 = vst.msk [vmem:[#allocation4] sm:$0xff] %vm65_vm0, %v437_v55 }
 0x307   :  { %v433_v58 = vpop.f32.mrb[2].mxu1 }
 0x308   :  { %v438_v59 = vadd.f32 %v433_v58, %v288_v57  ;;  %v517_v60 = vpop.f32.mrb[3].mxu1 }
 0x30a   :  { %440 = vst.msk [vmem:[#allocation4 + $0x8] sm:$0xff] %vm65_vm0, %v438_v59 }
 0x30d   :  { %v446_v0 = vld [vmem:[#allocation4] sm:$0xff] }
 0x311   :  { %v447_v3 = vld [vmem:[#allocation4 + $0x8] sm:$0xff] }
 0x348   :  { %v453_v61 = vpop.permute.xlu0 %452 }
 0x349   :  { %538 = vrcp.f32 %v453_v61 }
 0x34c   :  { %v458_v62 = vpop.permute.xlu0 %457 }
 0x34d   :  { %540 = vrcp.f32 %v458_v62 }
 0x353   :  { %v539_v63 = vpop.eup %538 }
 0x354   :  { %v461_v1 = vmul.f32 %v539_v63, %v446_v0 }
 0x356   :  { %464 = vst.msk [vmem:[#allocation11] sm:$0xff] %vm65_vm0, %v461_v1 }
 0x357   :  { %v541_v2 = vpop.eup %540 }
 0x358   :  { %v463_v4 = vmul.f32 %v541_v2, %v447_v3 }
 0x35a   :  { %465 = vst.msk [vmem:[#allocation11 + $0x8] sm:$0xff] %vm65_vm0, %v463_v4 }
 0x35b   :  { %619 = shalt.err (!%p616_p0)
}
 0x35c   :  { %s620_s27 = scalar_lea.hbm %s764_s3, 256 }
 0x35d   :  { %p621_p1 = scmp.ne.s32.totalorder %s764_s3, %s620_s27  ;;  %p624_p2 = scmp.lt.u32.totalorder %s620_s27, %s764_s3 }
 0x35f   :  { %p626_p3 = pnand %p624_p2, %p621_p1 }
 0x361   :  { %629 = shalt.err (!%p626_p3)
}
 0x362   :  { %477 = dma.vmem_to_hbm [thread:$0]  %s472_s21, 256, %s764_s3, [#allocation7], %s638_s24, %s638_s24, %s639_s25  }
 0x363   :  { %634 = dma.done.wait [#allocation7], 256  }
 0x364   :  { %635 = vsyncadd [#allocation7], 4294967040 }
 0x365   :  { %481 = vsyncpa [#allocation6], 1 }
 0x366   :  { %482 = vsyncpa [#allocation9], 1 }
 0x367   :  { %483 = vsyncpa [#allocation7], 1 }

</bundles_post_ra>
